<compile_context>
chip_gen: v6e
topology: v6e:2x2x1
jax: 0.10.0
libtpu: 0.0.40
codegen_flags: <defaults>
</compile_context>

<pallas_src>
import functools
import math

import jax
import jax.numpy as jnp
from jax.experimental import pallas as pl
from jax.experimental.pallas import tpu as pltpu

_LANES = 128
_SUBLANES = 8
_MAX_PACK_WIDTH = 1024  # cap on lcm(hidden, 128) for the lane-dense packed path


def _round_up(x, m):
    return (x + m - 1) // m * m


def _vmem_config():
    """Returns (per-tile byte budget, vmem_limit_bytes), gated on the chip's VMEM."""
    try:
        info = pltpu.get_tpu_info()
        vmem_bytes = int(getattr(info, "vmem_capacity_bytes", 0) or 0)
    except Exception:  # not queryable -> stay conservative
        vmem_bytes = 0
    if vmem_bytes >= 96 * 1024 * 1024:
        # v5e / v6e class parts: 128 MiB VMEM -> use most of it (bigger tiles,
        # fewer grid steps, better DMA efficiency for wide hidden).
        return 64 * 1024 * 1024, 96 * 1024 * 1024
    # v7x (64 MiB physical, 32 MiB default scoped) or unknown chip: conservative.
    return 24 * 1024 * 1024, 40 * 1024 * 1024


def _pick_tile_rows(rows, width_lanes, in_itemsize, out_itemsize, budget):
    """Largest row tile whose double-buffered in/out tiles + f32 temps fit `budget`."""
    # double-buffered input + output tiles plus ~4 f32 working copies of the tile
    per_row = width_lanes * (2 * in_itemsize + 2 * out_itemsize + 4 * 4)
    t = budget // per_row
    t = min(t, _round_up(rows, _SUBLANES))           # never allocate far beyond the data
    t = max(_SUBLANES, (t // _SUBLANES) * _SUBLANES)
    return int(t)


def _ln_rowwise_kernel(x_ref, gamma_ref, beta_ref, o_ref, *, eps, hidden):
    """General path: normalization axis == lane axis (block width == hidden)."""
    x = x_ref[...].astype(jnp.float32)
    mean = jnp.sum(x, axis=-1, keepdims=True) * (1.0 / hidden)
    d = x - mean                                     # two-pass stats: torch-like numerics
    var = jnp.sum(d * d, axis=-1, keepdims=True) * (1.0 / (hidden - 1))
    inv = 1.0 / (jnp.sqrt(var) + eps)                # tiny column; exact divide is free here
    o_ref[...] = (gamma_ref[...] * (d * inv) + beta_ref[...]).astype(o_ref.dtype)


def _ln_packed_kernel(x_ref, gsel_ref, ssel_ref, gamma_ref, beta_ref, o_ref, *, eps, hidden):
    """Packed path (short hidden): pack = width // hidden logical rows share one
    lane-dense register row.  Per-segment stats are gathered into a compact
    (tile, pack_pad) tensor via a (width, pack_pad) 0/1 selector matmul and
    broadcast back with its transpose -- ~width/pack fewer MXU flops than a
    full block-diagonal (width, width) matmul."""
    x = x_ref[...].astype(jnp.float32)
    gsel = gsel_ref[...]                             # (width, pack_pad) 0/1 gather selector
    ssel = ssel_ref[...]                             # (pack_pad, width) 0/1 scatter selector
    s = jnp.dot(x, gsel, preferred_element_type=jnp.float32)          # (tile, pack_pad)
    mean_c = s * (1.0 / hidden)
    mean = jnp.dot(mean_c, ssel, preferred_element_type=jnp.float32)  # (tile, width)
    d = x - mean
    ssq = jnp.dot(d * d, gsel, preferred_element_type=jnp.float32)    # (tile, pack_pad)
    inv_c = 1.0 / (jnp.sqrt(ssq * (1.0 / (hidden - 1))) + eps)
    inv = jnp.dot(inv_c, ssel, preferred_element_type=jnp.float32)    # (tile, width)
    o_ref[...] = (gamma_ref[...] * (d * inv) + beta_ref[...]).astype(o_ref.dtype)


def _layer_norm_jnp(x, gamma, beta, eps):
    """Plain-JAX fallback / reference (same semantics as the torch module)."""
    x32 = x.astype(jnp.float32)
    n = x.shape[-1]
    mean = jnp.mean(x32, axis=-1, keepdims=True)
    var = jnp.sum((x32 - mean) ** 2, axis=-1, keepdims=True) / (n - 1)  # Bessel, like torch.std
    out = (x32 - mean) / (jnp.sqrt(var) + eps)
    return (gamma.astype(jnp.float32) * out + beta.astype(jnp.float32)).astype(x.dtype)


def layer_norm(x, gamma, beta, eps=1e-6):
    """x: (..., hidden); gamma, beta: (hidden,). Returns same shape/dtype as x."""
    orig_shape = x.shape
    hidden = orig_shape[-1]
    if hidden < 2:
        raise ValueError("hidden_size must be >= 2 (torch.std uses the N-1 Bessel correction)")

    out_dtype = x.dtype
    rows = math.prod(orig_shape[:-1])

    tile_budget, vmem_limit = _vmem_config()

    # Very wide hidden: even an 8-row tile would blow the VMEM budget.
    # TODO(synk): add a hidden-split reduction grid axis (accumulate sum / sumsq
    # in VMEM scratch, finalize on the last block) instead of this JAX fallback.
    per_row_working = hidden * (2 * x.dtype.itemsize + 2 * out_dtype.itemsize + 4 * 4)
    if _SUBLANES * per_row_working > tile_budget:
        return _layer_norm_jnp(x, gamma, beta, eps)

    x2 = x.reshape(rows, hidden)
    gamma_f = gamma.reshape(-1).astype(jnp.float32)
    beta_f = beta.reshape(-1).astype(jnp.float32)

    # Lane-dense packing: width = lcm(hidden, 128) (bounded) so stores are full
    # unmasked 128-lane vst even for short / odd hidden sizes.
    pack, width = 1, hidden
    if hidden % _LANES != 0:
        lcm = hidden * _LANES // math.gcd(hidden, _LANES)
        if lcm <= _MAX_PACK_WIDTH:
            pack, width = lcm // hidden, lcm

    if pack == 1:
        rows_pad, rows_g, xw = rows, rows, x2       # no padding at all in this path
    else:
        rows_pad = _round_up(rows, pack)            # minimal pad (< pack rows), not tile_rows*pack
        if rows_pad != rows:
            x2 = jnp.pad(x2, ((0, rows_pad - rows), (0, 0)))
        rows_g = rows_pad // pack
        xw = x2.reshape(rows_g, width)

    tile_rows = _pick_tile_rows(rows_g, width, x.dtype.itemsize, out_dtype.itemsize, tile_budget)
    grid = (pl.cdiv(rows_g, tile_rows),)            # ragged last block handled by Pallas

    gamma_w = jnp.tile(gamma_f, pack).reshape(1, width)
    beta_w = jnp.tile(beta_f, pack).reshape(1, width)

    # TODO(synk): on v7x verify the row axis actually shards across both
    # TensorCores; if not, switch to pltpu.CORE_PARALLEL / an explicit core split.
    compiler_params = pltpu.CompilerParams(
        dimension_semantics=("parallel",),
        vmem_limit_bytes=vmem_limit,
    )

    if pack == 1:
        kernel = functools.partial(_ln_rowwise_kernel, eps=float(eps), hidden=hidden)
        in_arrays = (xw, gamma_w, beta_w)
        in_specs = [
            pl.BlockSpec((tile_rows, width), lambda i: (i, 0)),
            pl.BlockSpec((1, width), lambda i: (0, 0)),
            pl.BlockSpec((1, width), lambda i: (0, 0)),
        ]
    else:
        pack_pad = _round_up(pack, _SUBLANES)       # pad selector cols to a sublane multiple
        seg_id = jnp.arange(width, dtype=jnp.int32) // hidden
        col = jnp.arange(pack_pad, dtype=jnp.int32)
        gsel = (seg_id[:, None] == col[None, :]).astype(jnp.float32)   # (width, pack_pad)
        ssel = gsel.T                                                   # (pack_pad, width)
        kernel = functools.partial(_ln_packed_kernel, eps=float(eps), hidden=hidden)
        in_arrays = (xw, gsel, ssel, gamma_w, beta_w)
        in_specs = [
            pl.BlockSpec((tile_rows, width), lambda i: (i, 0)),
            pl.BlockSpec((width, pack_pad), lambda i: (0, 0)),
            pl.BlockSpec((pack_pad, width), lambda i: (0, 0)),
            pl.BlockSpec((1, width), lambda i: (0, 0)),
            pl.BlockSpec((1, width), lambda i: (0, 0)),
        ]

    out = pl.pallas_call(
        kernel,
        out_shape=jax.ShapeDtypeStruct((rows_g, width), out_dtype),
        grid_spec=pltpu.PrefetchScalarGridSpec(
            num_scalar_prefetch=0,
            grid=grid,
            in_specs=in_specs,
            out_specs=pl.BlockSpec((tile_rows, width), lambda i: (i, 0)),
        ),
        compiler_params=compiler_params,
    )(*in_arrays)

    if pack == 1:
        return out.reshape(orig_shape)
    out = out.reshape(rows_pad, hidden)
    if rows_pad != rows:
        out = out[:rows]
    return out.reshape(orig_shape)


if __name__ == "__main__":
    eps = 1e-6
    key = jax.random.PRNGKey(0)
    k1, k2, k3, k4, k5 = jax.random.split(key, 5)

    # primary shape implied by the module usage: (batch, seq, hidden)
    batch, seq, hidden = 2, 8, 32
    x = jax.random.normal(k1, (batch, seq, hidden), dtype=jnp.float32)
    gamma = jnp.ones((hidden,), dtype=jnp.float32)   # nn.Parameter(torch.ones(hidden))
    beta = jnp.zeros((hidden,), dtype=jnp.float32)   # nn.Parameter(torch.zeros(hidden))
    out = jax.block_until_ready(layer_norm(x, gamma, beta, eps=eps))
    ref = _layer_norm_jnp(x, gamma, beta, eps)
    assert out.shape == x.shape and out.dtype == x.dtype
    # headroom in case the tiny selector matmuls run at reduced MXU precision
    assert jnp.allclose(out, ref, atol=5e-3, rtol=5e-3), "packed path mismatch vs reference"

    # general row-wise path (hidden is a multiple of 128; pure VPU statistics)
    hidden2 = 256
    x2 = jax.random.normal(k2, (batch, seq, hidden2), dtype=jnp.float32)
    g2 = jnp.ones((hidden2,), dtype=jnp.float32)
    b2 = jnp.zeros((hidden2,), dtype=jnp.float32)
    out2 = jax.block_until_ready(layer_norm(x2, g2, b2, eps=eps))
    ref2 = _layer_norm_jnp(x2, g2, b2, eps)
    assert jnp.allclose(out2, ref2, atol=1e-4, rtol=1e-4), "row-wise path mismatch vs reference"

    # generalized lcm packing (hidden=96 -> width=384, pack=4) + ragged row count
    hidden3 = 96
    x3 = jax.random.normal(k3, (3, 5, hidden3), dtype=jnp.float32)   # 15 rows, not multiple of pack
    g3 = 1.0 + 0.1 * jax.random.normal(k4, (hidden3,), dtype=jnp.float32)
    b3 = 0.1 * jax.random.normal(k5, (hidden3,), dtype=jnp.float32)
    out3 = jax.block_until_ready(layer_norm(x3, g3, b3, eps=eps))
    ref3 = _layer_norm_jnp(x3, g3, b3, eps)
    assert jnp.allclose(out3, ref3, atol=5e-3, rtol=5e-3), "lcm-packed path mismatch vs reference"

    print("KERNEL_OK")
</pallas_src>

<mosaic_0001>
module attributes {stable_mosaic.version = 11 : i64} {
  func.func @_ln_packed_kernel(%arg0: i32, %arg1: memref<8x128xf32, #tpu.memory_space<vmem>>, %arg2: memref<128x8xf32, #tpu.memory_space<vmem>>, %arg3: memref<8x128xf32, #tpu.memory_space<vmem>>, %arg4: memref<1x128xf32, #tpu.memory_space<vmem>>, %arg5: memref<1x128xf32, #tpu.memory_space<vmem>>, %arg6: memref<8x128xf32, #tpu.memory_space<vmem>>) attributes {dimension_semantics = [#tpu.dimension_semantics<parallel>], iteration_bounds = array<i64: 1>, scalar_prefetch = 0 : i64, scratch_operands = 0 : i64, tpu.core_type = #tpu.core_type<tc>, window_params = [{transform_indices = @transform_0, window_bounds = array<i64: 8, 128>}, {pipeline_mode = #tpu.pipeline_mode<synchronous>, transform_indices = @transform_1, window_bounds = array<i64: 128, 8>}, {pipeline_mode = #tpu.pipeline_mode<synchronous>, transform_indices = @transform_2, window_bounds = array<i64: 8, 128>}, {pipeline_mode = #tpu.pipeline_mode<synchronous>, transform_indices = @transform_3, window_bounds = array<i64: 1, 128>}, {pipeline_mode = #tpu.pipeline_mode<synchronous>, transform_indices = @transform_4, window_bounds = array<i64: 1, 128>}, {transform_indices = @transform_5, window_bounds = array<i64: 8, 128>}]} {
    %c0 = arith.constant 0 : index
    %c0_0 = arith.constant 0 : index
    %0 = vector.load %arg1[%c0, %c0_0] : memref<8x128xf32, #tpu.memory_space<vmem>>, vector<8x128xf32>
    %c0_1 = arith.constant 0 : index
    %c0_2 = arith.constant 0 : index
    %1 = vector.load %arg2[%c0_1, %c0_2] : memref<128x8xf32, #tpu.memory_space<vmem>>, vector<128x8xf32>
    %c0_3 = arith.constant 0 : index
    %c0_4 = arith.constant 0 : index
    %2 = vector.load %arg3[%c0_3, %c0_4] : memref<8x128xf32, #tpu.memory_space<vmem>>, vector<8x128xf32>
    %cst = arith.constant dense<0.000000e+00> : vector<8x8xf32>
    %3 = tpu.matmul %0, %1, %cst {dimension_numbers = #tpu.dot_dimension_numbers<[1], [0], [0], [1], [0, 0, 1, 1], [], []>} : vector<8x128xf32>, vector<128x8xf32>, vector<8x8xf32> -> vector<8x8xf32>
    %cst_5 = arith.constant 3.125000e-02 : f32
    %4 = vector.broadcast %cst_5 : f32 to vector<8x8xf32>
    %5 = arith.mulf %3, %4 : vector<8x8xf32>
    %cst_6 = arith.constant dense<0.000000e+00> : vector<8x128xf32>
    %6 = tpu.matmul %5, %2, %cst_6 {dimension_numbers = #tpu.dot_dimension_numbers<[1], [0], [0], [1], [0, 0, 1, 1], [], []>} : vector<8x8xf32>, vector<8x128xf32>, vector<8x128xf32> -> vector<8x128xf32>
    %7 = arith.subf %0, %6 : vector<8x128xf32>
    %8 = arith.mulf %7, %7 : vector<8x128xf32>
    %cst_7 = arith.constant dense<0.000000e+00> : vector<8x8xf32>
    %9 = tpu.matmul %8, %1, %cst_7 {dimension_numbers = #tpu.dot_dimension_numbers<[1], [0], [0], [1], [0, 0, 1, 1], [], []>} : vector<8x128xf32>, vector<128x8xf32>, vector<8x8xf32> -> vector<8x8xf32>
    %cst_8 = arith.constant 0.0322580636 : f32
    %10 = vector.broadcast %cst_8 : f32 to vector<8x8xf32>
    %11 = arith.mulf %9, %10 : vector<8x8xf32>
    %12 = math.sqrt %11 : vector<8x8xf32>
    %cst_9 = arith.constant 9.99999997E-7 : f32
    %13 = vector.broadcast %cst_9 : f32 to vector<8x8xf32>
    %14 = arith.addf %12, %13 : vector<8x8xf32>
    %cst_10 = arith.constant 1.000000e+00 : f32
    %15 = vector.broadcast %cst_10 : f32 to vector<8x8xf32>
    %16 = arith.divf %15, %14 : vector<8x8xf32>
    %cst_11 = arith.constant dense<0.000000e+00> : vector<8x128xf32>
    %17 = tpu.matmul %16, %2, %cst_11 {dimension_numbers = #tpu.dot_dimension_numbers<[1], [0], [0], [1], [0, 0, 1, 1], [], []>} : vector<8x8xf32>, vector<8x128xf32>, vector<8x128xf32> -> vector<8x128xf32>
    %c0_12 = arith.constant 0 : index
    %c0_13 = arith.constant 0 : index
    %18 = vector.load %arg4[%c0_12, %c0_13] : memref<1x128xf32, #tpu.memory_space<vmem>>, vector<1x128xf32>
    %19 = arith.mulf %7, %17 : vector<8x128xf32>
    %20 = vector.broadcast %18 : vector<1x128xf32> to vector<8x128xf32>
    %21 = arith.mulf %20, %19 : vector<8x128xf32>
    %c0_14 = arith.constant 0 : index
    %c0_15 = arith.constant 0 : index
    %22 = vector.load %arg5[%c0_14, %c0_15] : memref<1x128xf32, #tpu.memory_space<vmem>>, vector<1x128xf32>
    %23 = vector.broadcast %22 : vector<1x128xf32> to vector<8x128xf32>
    %24 = arith.addf %21, %23 : vector<8x128xf32>
    %c0_16 = arith.constant 0 : index
    %c0_17 = arith.constant 0 : index
    %25 = vector.load %arg6[%c0_16, %c0_17] : memref<8x128xf32, #tpu.memory_space<vmem>>, vector<8x128xf32>
    tpu.vector_store %arg6[%c0_16, %c0_17], %24 {strides = array<i32>} : memref<8x128xf32, #tpu.memory_space<vmem>>, vector<8x128xf32>,
    return
  }
  func.func @transform_0(%arg0: i32) -> (i32, i32) {
    %c0_i32 = arith.constant 0 : i32
    %c0_i32_0 = arith.constant 0 : i32
    return %arg0, %c0_i32 : i32, i32
  }
  func.func @transform_1(%arg0: i32) -> (i32, i32) {
    %c0_i32 = arith.constant 0 : i32
    %c0_i32_0 = arith.constant 0 : i32
    %c0_i32_1 = arith.constant 0 : i32
    return %c0_i32, %c0_i32_0 : i32, i32
  }
  func.func @transform_2(%arg0: i32) -> (i32, i32) {
    %c0_i32 = arith.constant 0 : i32
    %c0_i32_0 = arith.constant 0 : i32
    %c0_i32_1 = arith.constant 0 : i32
    return %c0_i32, %c0_i32_0 : i32, i32
  }
  func.func @transform_3(%arg0: i32) -> (i32, i32) {
    %c0_i32 = arith.constant 0 : i32
    %c0_i32_0 = arith.constant 0 : i32
    %c0_i32_1 = arith.constant 0 : i32
    return %c0_i32, %c0_i32_0 : i32, i32
  }
  func.func @transform_4(%arg0: i32) -> (i32, i32) {
    %c0_i32 = arith.constant 0 : i32
    %c0_i32_0 = arith.constant 0 : i32
    %c0_i32_1 = arith.constant 0 : i32
    return %c0_i32, %c0_i32_0 : i32, i32
  }
  func.func @transform_5(%arg0: i32) -> (i32, i32) {
    %c0_i32 = arith.constant 0 : i32
    %c0_i32_0 = arith.constant 0 : i32
    return %arg0, %c0_i32 : i32, i32
  }
}

</mosaic_0001>

<bundles_post_ra>
// kernel: tpu_custom_call.1
= control target key start
LH: loop header
LB: loop body
LE: loop exit
PB: predicated region body
PF: predicated region fallthrough
CT: control target
= control target key end

     0   :  { %10 = vsyncpa [#allocation3], 0  ;;  %v527_v1 = vmov 0.0   ;;  %vm528_vm0 = vmmov 0   ;;  %vm110_vm1 = vcmask 64512   ;;  %s677_s0 = inlined_call_operand.vmem [shape: f32[4,128], index: 0, kind: input, shape index: {}]   ;;  %s678_s1 = inlined_call_operand.vmem [shape: f32[128,8], index: 1, kind: input, shape index: {}]   ;;  %s679_s2 = inlined_call_operand.vmem [shape: f32[8,128], index: 2, kind: input, shape index: {}]   ;;  %s680_s3 = inlined_call_operand.vmem [shape: f32[1,128], index: 3, kind: input, shape index: {}]   ;;  %s681_s4 = inlined_call_operand.vmem [shape: f32[1,128], index: 4, kind: input, shape index: {}]   ;;  %s682_s5 = inlined_call_operand.hbm [shape: f32[4,128], index: 5, kind: output, shape index: {}]  }
   0x1   :  { %v565_v0 = vld [vmem:[%s678_s1 + $0x78] sm:$0xff]  ;;  %416 = vmatprep.subr.mxu0 %v527_v1  ;;  %v571_v2 = vld [vmem:[%s678_s1 + $0x70] sm:$0xff]  ;;  %448 = vmatprep.mubr.msk.f32.mxu0 %vm528_vm0, %v527_v1  ;;  %v35_v3 = vld [vmem:[%s678_s1 + $0x68] sm:$0xff] }
   0x2   :  { %417 = vmatpush3.msra.mxu0 %v565_v0  ;;  %451 = vmatprep.subr.mxu1 %v527_v1  ;;  %v34_v4 = vld [vmem:[%s678_s1 + $0x60] sm:$0xff]  ;;  %v33_v5 = vld [vmem:[%s678_s1 + $0x58] sm:$0xff]  ;;  %v32_v6 = vld [vmem:[%s678_s1 + $0x50] sm:$0xff] }
   0x3   :  { %418 = vmatprep.subr.mxu0 %v527_v1  ;;  %453 = vmatprep.mubr.msk.f32.mxu1 %vm528_vm0, %v527_v1  ;;  %v31_v7 = vld [vmem:[%s678_s1 + $0x48] sm:$0xff]  ;;  %v30_v8 = vld [vmem:[%s678_s1 + $0x40] sm:$0xff]  ;;  %v29_v9 = vld [vmem:[%s678_s1 + $0x38] sm:$0xff] }
   0x4   :  { %419 = vmatpush3.msra.mxu0 %v571_v2  ;;  %v28_v10 = vld [vmem:[%s678_s1 + $0x30] sm:$0xff]  ;;  %v27_v11 = vld [vmem:[%s678_s1 + $0x28] sm:$0xff]  ;;  %v26_v12 = vld [vmem:[%s678_s1 + $0x20] sm:$0xff] }
   0x5   :  { %420 = vmatprep.subr.mxu0 %v527_v1  ;;  %v25_v13 = vld [vmem:[%s678_s1 + $0x18] sm:$0xff]  ;;  %v24_v14 = vld [vmem:[%s678_s1 + $0x10] sm:$0xff]  ;;  %v23_v15 = vld [vmem:[%s678_s1 + $0x8] sm:$0xff] }
   0x6   :  { %421 = vmatpush3.msra.mxu0 %v35_v3  ;;  %v22_v16 = vld [vmem:[%s678_s1] sm:$0xff] }
   0x7   :  { %422 = vmatprep.subr.mxu0 %v527_v1  ;;  %v21_v17 = vld [vmem:[%s677_s0] sm:$0xff] }
   0x8   :  { %423 = vmatpush3.msra.mxu0 %v34_v4  ;;  %v38_v18 = vld [vmem:[%s679_s2] sm:$0xff] }
   0x9   :  { %424 = vmatprep.subr.mxu0 %v527_v1  ;;  %452 = vmatpush3.msra.mxu1 %v38_v18  ;;  %v376_v37 = vld [vmem:[%s680_s3] ss:$0 sm:$0xff] }
   0xa   :  { %425 = vmatpush3.msra.mxu0 %v33_v5  ;;  %456 = vmatprep.subr.mxu1 %v527_v1  ;;  %v377_v39 = vld [vmem:[%s681_s4] ss:$0 sm:$0xff] }
   0xb   :  { %426 = vmatprep.subr.mxu0 %v527_v1 }
   0xc   :  { %427 = vmatpush3.msra.mxu0 %v32_v6 }
   0xd   :  { %428 = vmatprep.subr.mxu0 %v527_v1 }
   0xe   :  { %429 = vmatpush3.msra.mxu0 %v31_v7 }
   0xf   :  { %430 = vmatprep.subr.mxu0 %v527_v1 }
  0x10   :  { %431 = vmatpush3.msra.mxu0 %v30_v8 }
  0x11   :  { %432 = vmatprep.subr.mxu0 %v527_v1 }
  0x12   :  { %433 = vmatpush3.msra.mxu0 %v29_v9 }
  0x13   :  { %434 = vmatprep.subr.mxu0 %v527_v1 }
  0x14   :  { %435 = vmatpush3.msra.mxu0 %v28_v10 }
  0x15   :  { %436 = vmatprep.subr.mxu0 %v527_v1 }
  0x16   :  { %437 = vmatpush3.msra.mxu0 %v27_v11 }
  0x17   :  { %438 = vmatprep.subr.mxu0 %v527_v1 }
  0x18   :  { %439 = vmatpush3.msra.mxu0 %v26_v12 }
  0x19   :  { %440 = vmatprep.subr.mxu0 %v527_v1 }
  0x1a   :  { %441 = vmatpush3.msra.mxu0 %v25_v13 }
  0x1b   :  { %442 = vmatprep.subr.mxu0 %v527_v1 }
  0x1c   :  { %443 = vmatpush3.msra.mxu0 %v24_v14 }
  0x1d   :  { %444 = vmatprep.subr.mxu0 %v527_v1 }
  0x1e   :  { %445 = vmatpush3.msra.mxu0 %v23_v15 }
  0x1f   :  { %446 = vmatprep.subr.mxu0 %v527_v1 }
  0x20   :  { %447 = vmatpush3.msra.mxu0 %v22_v16 }
  0x21   :  { %449 = vmatmul.mubr.f32.vlgmr.msra.gmra.mxu0 %v21_v17  ;;  %491 = vmatprep.subr.mxu0 %v527_v1 }
  0x22   :  { %493 = vmatprep.mubr.msk.f32.mxu0 %vm528_vm0, %v527_v1  ;;  %492 = vmatpush3.msra.mxu0 %v38_v18 }
  0xe1   :  { %v105_v19 = vpop.f32.mrf.mxu0 }
  0xe2   :  { %v109_v20 = vmul.f32 0.03125, %v105_v19 }
  0xe3   :  { %v450_v21 = vpop.f32.mrf.mxu0 }
  0xe4   :  { %454 = vmatmul.mubr.msk.f32.vlgmr.msra.gmra.mxu1 %vm110_vm1, %v109_v20 }
  0xe5   :  { %457 = vmatpush3.msra.mxu1 %v565_v0  ;;  %488 = vmatprep.mubr.msk.f32.mxu1 %vm528_vm0, %v527_v1 }
  0xe6   :  { %458 = vmatprep.subr.mxu1 %v527_v1 }
  0xe7   :  { %459 = vmatpush3.msra.mxu1 %v571_v2 }
  0xe8   :  { %460 = vmatprep.subr.mxu1 %v527_v1 }
  0xe9   :  { %461 = vmatpush3.msra.mxu1 %v35_v3 }
  0xea   :  { %462 = vmatprep.subr.mxu1 %v527_v1 }
  0xeb   :  { %463 = vmatpush3.msra.mxu1 %v34_v4 }
  0xec   :  { %464 = vmatprep.subr.mxu1 %v527_v1 }
  0xed   :  { %465 = vmatpush3.msra.mxu1 %v33_v5 }
  0xee   :  { %466 = vmatprep.subr.mxu1 %v527_v1 }
  0xef   :  { %467 = vmatpush3.msra.mxu1 %v32_v6 }
  0xf0   :  { %468 = vmatprep.subr.mxu1 %v527_v1 }
  0xf1   :  { %469 = vmatpush3.msra.mxu1 %v31_v7 }
  0xf2   :  { %470 = vmatprep.subr.mxu1 %v527_v1 }
  0xf3   :  { %471 = vmatpush3.msra.mxu1 %v30_v8 }
  0xf4   :  { %472 = vmatprep.subr.mxu1 %v527_v1 }
  0xf5   :  { %473 = vmatpush3.msra.mxu1 %v29_v9 }
  0xf6   :  { %474 = vmatprep.subr.mxu1 %v527_v1 }
  0xf7   :  { %475 = vmatpush3.msra.mxu1 %v28_v10 }
  0xf8   :  { %476 = vmatprep.subr.mxu1 %v527_v1 }
  0xf9   :  { %477 = vmatpush3.msra.mxu1 %v27_v11 }
  0xfa   :  { %478 = vmatprep.subr.mxu1 %v527_v1 }
  0xfb   :  { %479 = vmatpush3.msra.mxu1 %v26_v12 }
  0xfc   :  { %480 = vmatprep.subr.mxu1 %v527_v1 }
  0xfd   :  { %481 = vmatpush3.msra.mxu1 %v25_v13 }
  0xfe   :  { %482 = vmatprep.subr.mxu1 %v527_v1 }
  0xff   :  { %483 = vmatpush3.msra.mxu1 %v24_v14 }
 0x100   :  { %484 = vmatprep.subr.mxu1 %v527_v1 }
 0x101   :  { %485 = vmatpush3.msra.mxu1 %v23_v15 }
 0x102   :  { %486 = vmatprep.subr.mxu1 %v527_v1 }
 0x103   :  { %487 = vmatpush3.msra.mxu1 %v22_v16 }
 0x1a4   :  { %v180_v22 = vpop.f32.mrf.mxu1 }
 0x1a5   :  { %v184_v23 = vsub.f32 %v21_v17, %v180_v22 }
 0x1a6   :  { %v455_v24 = vpop.f32.mrf.mxu1 }
 0x1a7   :  { %v185_v25 = vmul.f32 %v184_v23, %v184_v23 }
 0x1a9   :  { %489 = vmatmul.mubr.f32.vlgmr.msra.gmra.mxu1 %v185_v25 }
 0x269   :  { %v252_v26 = vpop.f32.mrf.mxu1 }
 0x26a   :  { %v256_v27 = vmul.f32 0.032258064, %v252_v26 }
 0x26b   :  { %v490_v28 = vpop.f32.mrf.mxu1 }
 0x26c   :  { %501 = vrsqrt.f32 %v256_v27  ;;  %vm259_vm2 = vcmp.eq.f32.partialorder %v256_v27, inf  ;;  %v262_v31 = vand.u32 2147483648, %v256_v27  ;;  %vm261_vm3 = vcmp.eq.f32.partialorder %v256_v27, 0.0 }
 0x279   :  { %v502_v29 = vpop.eup %501 }
 0x27a   :  { %v258_v30 = vmul.f32 %v502_v29, %v256_v27 }
 0x27c   :  { %v260_v32 = vsel %vm259_vm2, %v256_v27, %v258_v30 }
 0x27d   :  { %v263_v33 = vsel %vm261_vm3, %v262_v31, %v260_v32 }
 0x27e   :  { %v264_v34 = vadd.f32 1e-06, %v263_v33 }
 0x280   :  { %503 = vrcp.f32 %v264_v34 }
 0x28d   :  { %v504_v35 = vpop.eup %503 }
 0x28e   :  { %494 = vmatmul.mubr.msk.f32.vlgmr.msra.gmra.mxu0 %vm110_vm1, %v504_v35 }
 0x34e   :  { %v336_v36 = vpop.f32.mrf.mxu0 }
 0x34f   :  { %v341_v38 = vmul.f32 %v336_v36, %v184_v23 }
 0x350   :  { %v495_v40 = vpop.f32.mrf.mxu0 }
 0x351   :  { %v348_v41 = vmul.f32 %v376_v37, %v341_v38 }
 0x353   :  { %v356_v42 = vadd.f32 %v377_v39, %v348_v41 }
 0x355   :  { %357 = vst [vmem:[#allocation2] sm:$0xff] %v356_v42 }
 0x356   :  { %362 = vsyncadd [#allocation3], 64  ;;  %s529_s30 = smov [#allocation2]  }
 0x357   :  { %s363_s6 = sshll.u32 %s529_s30, 4  ;;  %s364_s6 = int_to_ptr.vmem [resolvable:$true] %s363_s6 }
 0x358   :  { %s505_s7 = scalar_lea.vmem %s364_s6, 64  ;;  %s509_s8 = scalar_lea.vmem %s364_s6, 128 }
 0x359   :  { %p506_p0 = scmp.ne.s32.totalorder %s364_s6, %s505_s7  ;;  %p510_p1 = scmp.lt.s32.totalorder %s364_s6, %s364_s6 }
 0x35a   :  { %p511_p2 = scmp.lt.s32.totalorder %s509_s8, %s505_s7 }
 0x35c   :  { %p512_p3 = por %p511_p2, %p510_p1 }
 0x35e   :  { %p513_p4 = pnand %p512_p3, %p506_p0 }
 0x360   :  { %516 = shalt.err (!%p513_p4)
}
 0x361   :  { %s530_s3 = smov 64   ;;  %s531_s9 = smov 4  }
 0x362   :  { %369 = dma.vmem_to_hbm [thread:$0]  %s364_s6, 64, %s682_s5, [#allocation3], %s530_s3, %s530_s3, %s531_s9  }
 0x363   :  { %525 = dma.done.wait [#allocation3], 128  }
 0x364   :  { %526 = vsyncadd [#allocation3], 4294967168 }
 0x365   :  { %373 = vsyncpa [#allocation3], 1 }

</bundles_post_ra>
